<compile_context>
chip_gen: v5e
topology: v5e:2x2
jax: 0.10.0
libtpu: 0.0.40
codegen_flags: <defaults>
</compile_context>

<pallas_src>
import math

import jax
import jax.numpy as jnp
from jax import lax
from jax.experimental import pallas as pl
from jax.experimental.pallas import tpu as pltpu


_ONEHOT_MAX_VOCAB = 2048            # keep the (T, V) one-hot VALU work bounded
_ONEHOT_MAX_TABLE_BYTES = 6 << 20   # resident table (double-buffered) stays small
_DEFAULT_BLOCK_TOKENS = 256         # tokens per grid step (multiple of 8)
_OUT_BLOCK_VMEM_BUDGET = 8 << 20    # budget for the double-buffered output block
_VMEM_LIMIT_BYTES = 32 << 20        # explicit scoped-VMEM limit (safe on v5e/v6e/v7x)
_DMA_UNROLL = 8                     # unroll factor for the start/wait DMA loops


def _round_up(x: int, m: int) -> int:
    return (x + m - 1) // m * m


# ---------------------------------------------------------------------------
# Path A: small vocabulary. Table resident in VMEM, rows selected via one-hot
# matmul on the MXU, dense (T, d_model) store.
# ---------------------------------------------------------------------------
def _make_onehot_kernel(scale: float, vocab_size: int):
    def kernel(ids_ref, emb_ref, out_ref):
        ids = ids_ref[...]                                    # (T, 1) int32
        iota = lax.broadcasted_iota(jnp.int32, (ids.shape[0], vocab_size), 1)
        onehot = (ids == iota).astype(emb_ref.dtype)          # (T, vocab)
        rows = jnp.dot(onehot, emb_ref[...],
                       preferred_element_type=jnp.float32)    # (T, d_pad) f32
        out_ref[...] = (rows * scale).astype(out_ref.dtype)

    return kernel


# ---------------------------------------------------------------------------
# Path B: general vocabulary. Manual HBM row-gather with per-row DMAs issued
# straight into the pipelined output block, then one in-place vectorized scale.
# ---------------------------------------------------------------------------
def _make_hbm_gather_kernel(scale: float, tokens_per_block: int, unroll: int):
    def kernel(ids_smem, emb_hbm, out_ref, sems):
        base = pl.program_id(0) * tokens_per_block

        def row_copy(t):
            # Same descriptor for start and wait: src row, dst slice, semaphore.
            tok = ids_smem[base + t]
            return pltpu.make_async_copy(
                emb_hbm.at[pl.ds(tok, 1), :],
                out_ref.at[pl.ds(t, 1), :],      # gather directly into the out block
                sems.at[t],
            )

        def start_body(t, carry):
            row_copy(t).start()
            return carry

        def wait_body(t, carry):
            row_copy(t).wait()
            return carry

        # Start every row gather of this block (up to T DMAs in flight), then
        # retire them all. All scalar id reads happen before any wait.
        lax.fori_loop(0, tokens_per_block, start_body, 0, unroll=unroll)
        lax.fori_loop(0, tokens_per_block, wait_body, 0, unroll=unroll)

        # One vectorized scale pass, in place on the output block.
        out_ref[...] = (out_ref[...].astype(jnp.float32) * scale).astype(out_ref.dtype)

    return kernel


# ---------------------------------------------------------------------------
# Wrapper
# ---------------------------------------------------------------------------
def input_embeddings_forward(token_ids: jax.Array, embedding: jax.Array, *,
                             block_tokens: int = _DEFAULT_BLOCK_TOKENS) -> jax.Array:
    """Pallas equivalent of InputEmbeddings.forward.

    token_ids: int32 array of shape (batch, seq)
    embedding: float array of shape (vocab_size, d_model)
    returns:   array of shape (batch, seq, d_model), embedding.dtype
    """
    batch, seq = token_ids.shape
    vocab_size, d_model = embedding.shape
    n_tokens = batch * seq
    scale = math.sqrt(d_model)
    itemsize = embedding.dtype.itemsize

    # Lane-pad d_model so every output tile is lane-dense (unmasked vst).
    d_pad = _round_up(d_model, 128)
    emb_p = embedding if d_pad == d_model else jnp.pad(
        embedding, ((0, 0), (0, d_pad - d_model)))

    # Clamp ids so a bad token can never become an out-of-bounds DMA.
    flat_ids = jnp.clip(token_ids.reshape(n_tokens).astype(jnp.int32), 0, vocab_size - 1)

    # Token-block sizing: as large as requested, but keep the double-buffered
    # (T, d_pad) output block within budget and T a multiple of 8.
    max_tok_by_vmem = max(8, (_OUT_BLOCK_VMEM_BUDGET // (2 * d_pad * itemsize)) // 8 * 8)
    tokens_per_block = min(block_tokens, _round_up(n_tokens, 8), max_tok_by_vmem)
    tokens_per_block = max(8, _round_up(tokens_per_block, 8))
    n_blocks = pl.cdiv(n_tokens, tokens_per_block)
    n_pad = n_blocks * tokens_per_block
    if n_pad != n_tokens:
        flat_ids = jnp.pad(flat_ids, (0, n_pad - n_tokens))   # pad with id 0 (valid row)

    table_bytes = vocab_size * d_pad * itemsize
    use_onehot = (vocab_size <= _ONEHOT_MAX_VOCAB
                  and table_bytes <= _ONEHOT_MAX_TABLE_BYTES)

    cparams = pltpu.CompilerParams(dimension_semantics=("parallel",),
                                   vmem_limit_bytes=_VMEM_LIMIT_BYTES)

    if use_onehot:
        ids_2d = flat_ids.reshape(n_pad, 1)
        grid_spec = pltpu.PrefetchScalarGridSpec(
            num_scalar_prefetch=0,
            grid=(n_blocks,),
            in_specs=[
                pl.BlockSpec((tokens_per_block, 1), lambda i: (i, 0)),
                # Whole (padded) table resident in VMEM (same block every step).
                pl.BlockSpec((vocab_size, d_pad), lambda i: (0, 0)),
            ],
            out_specs=pl.BlockSpec((tokens_per_block, d_pad), lambda i: (i, 0)),
        )
        out_flat = pl.pallas_call(
            _make_onehot_kernel(scale, vocab_size),
            out_shape=jax.ShapeDtypeStruct((n_pad, d_pad), embedding.dtype),
            grid_spec=grid_spec,
            compiler_params=cparams,
        )(ids_2d, emb_p)
    else:
        unroll = min(_DMA_UNROLL, tokens_per_block)
        grid_spec = pltpu.PrefetchScalarGridSpec(
            num_scalar_prefetch=1,                         # flat ids -> SMEM
            grid=(n_blocks,),
            in_specs=[pl.BlockSpec(memory_space=pl.ANY)],  # table stays in HBM
            out_specs=pl.BlockSpec((tokens_per_block, d_pad), lambda i, ids: (i, 0)),
            scratch_shapes=[
                pltpu.SemaphoreType.DMA((tokens_per_block,)),  # one sem per row gather
            ],
        )
        out_flat = pl.pallas_call(
            _make_hbm_gather_kernel(scale, tokens_per_block, unroll),
            out_shape=jax.ShapeDtypeStruct((n_pad, d_pad), embedding.dtype),
            grid_spec=grid_spec,
            compiler_params=cparams,
        )(flat_ids, emb_p)

    if n_pad != n_tokens:
        out_flat = out_flat[:n_tokens]
    out = out_flat.reshape(batch, seq, d_pad)
    if d_pad != d_model:
        out = out[..., :d_model]
    return out


if __name__ == "__main__":
    key = jax.random.PRNGKey(0)

    # ---- Test 1: small vocab -> VMEM-resident table (one-hot / MXU) path ----
    d_model, vocab_size, batch, seq = 128, 64, 2, 8
    k_emb, k_ids, key = jax.random.split(key, 3)
    emb = jax.random.normal(k_emb, (vocab_size, d_model), dtype=jnp.float32)
    ids = jax.random.randint(k_ids, (batch, seq), 0, vocab_size, dtype=jnp.int32)

    out = jax.block_until_ready(input_embeddings_forward(ids, emb))
    ref = emb[ids] * math.sqrt(d_model)
    assert out.shape == (batch, seq, d_model)
    assert jnp.allclose(out, ref, atol=1e-5, rtol=1e-5)

    # ---- Test 2: larger vocab -> manual-DMA gather path (multi-block, padded
    # tail, non-multiple-of-128 d_model to exercise lane padding) ----
    d_model2, vocab2, batch2, seq2 = 192, 4000, 2, 200
    k_emb2, k_ids2, key = jax.random.split(key, 3)
    emb2 = jax.random.normal(k_emb2, (vocab2, d_model2), dtype=jnp.float32)
    ids2 = jax.random.randint(k_ids2, (batch2, seq2), 0, vocab2, dtype=jnp.int32)

    out2 = jax.block_until_ready(input_embeddings_forward(ids2, emb2))
    ref2 = emb2[ids2] * math.sqrt(d_model2)
    assert out2.shape == (batch2, seq2, d_model2)
    assert jnp.allclose(out2, ref2, atol=1e-5, rtol=1e-5)

    print("KERNEL_OK")
</pallas_src>

<mosaic_0001>
module attributes {stable_mosaic.version = 11 : i64} {
  func.func @kernel(%arg0: i32, %arg1: memref<16x1xi32, #tpu.memory_space<vmem>>, %arg2: memref<64x128xf32, #tpu.memory_space<vmem>>, %arg3: memref<16x128xf32, #tpu.memory_space<vmem>>) attributes {dimension_semantics = [#tpu.dimension_semantics<parallel>], iteration_bounds = array<i64: 1>, scalar_prefetch = 0 : i64, scratch_operands = 0 : i64, tpu.core_type = #tpu.core_type<tc>, window_params = [{transform_indices = @transform_0, window_bounds = array<i64: 16, 1>}, {pipeline_mode = #tpu.pipeline_mode<synchronous>, transform_indices = @transform_1, window_bounds = array<i64: 64, 128>}, {transform_indices = @transform_2, window_bounds = array<i64: 16, 128>}]} {
    %c0 = arith.constant 0 : index
    %c0_0 = arith.constant 0 : index
    %0 = vector.load %arg1[%c0, %c0_0] : memref<16x1xi32, #tpu.memory_space<vmem>>, vector<16x1xi32>
    %1 = tpu.iota {dimensions = array<i32: 1>} : vector<16x64xi32>
    %2 = vector.broadcast %0 : vector<16x1xi32> to vector<16x64xi32>
    %3 = arith.cmpi eq, %2, %1 : vector<16x64xi32>
    %4 = arith.extui %3 : vector<16x64xi1> to vector<16x64xi32>
    %5 = arith.sitofp %4 : vector<16x64xi32> to vector<16x64xf32>
    %c0_1 = arith.constant 0 : index
    %c0_2 = arith.constant 0 : index
    %6 = vector.load %arg2[%c0_1, %c0_2] : memref<64x128xf32, #tpu.memory_space<vmem>>, vector<64x128xf32>
    %cst = arith.constant dense<0.000000e+00> : vector<16x128xf32>
    %7 = tpu.matmul %5, %6, %cst {dimension_numbers = #tpu.dot_dimension_numbers<[1], [0], [0], [1], [0, 0, 1, 1], [], []>} : vector<16x64xf32>, vector<64x128xf32>, vector<16x128xf32> -> vector<16x128xf32>
    %cst_3 = arith.constant 11.3137083 : f32
    %8 = vector.broadcast %cst_3 : f32 to vector<16x128xf32>
    %9 = arith.mulf %7, %8 : vector<16x128xf32>
    %c0_4 = arith.constant 0 : index
    %c0_5 = arith.constant 0 : index
    %10 = vector.load %arg3[%c0_4, %c0_5] : memref<16x128xf32, #tpu.memory_space<vmem>>, vector<16x128xf32>
    tpu.vector_store %arg3[%c0_4, %c0_5], %9 {strides = array<i32>} : memref<16x128xf32, #tpu.memory_space<vmem>>, vector<16x128xf32>,
    return
  }
  func.func @transform_0(%arg0: i32) -> (i32, i32) {
    %c0_i32 = arith.constant 0 : i32
    %c0_i32_0 = arith.constant 0 : i32
    return %arg0, %c0_i32 : i32, i32
  }
  func.func @transform_1(%arg0: i32) -> (i32, i32) {
    %c0_i32 = arith.constant 0 : i32
    %c0_i32_0 = arith.constant 0 : i32
    %c0_i32_1 = arith.constant 0 : i32
    return %c0_i32, %c0_i32_0 : i32, i32
  }
  func.func @transform_2(%arg0: i32) -> (i32, i32) {
    %c0_i32 = arith.constant 0 : i32
    %c0_i32_0 = arith.constant 0 : i32
    return %arg0, %c0_i32 : i32, i32
  }
}

</mosaic_0001>

<bundles_post_ra>
// kernel: tpu_custom_call.1
= control target key start
LH: loop header
LB: loop body
LE: loop exit
PB: predicated region body
PF: predicated region fallthrough
CT: control target
= control target key end

     0   :  { %7 = vsyncpa [#allocation3], 0  ;;  %s215_s0 = inlined_call_operand.vmem [shape: s32[16,1], index: 0, kind: input, shape index: {}]   ;;  %s216_s1 = inlined_call_operand.hbm [shape: f32[64,128], index: 1, kind: input, shape index: {}]   ;;  %s217_s2 = inlined_call_operand.hbm [shape: f32[16,128], index: 2, kind: output, shape index: {}]  }
   0x1   :  { %8 = vsyncpa [#allocation4], 0  ;;  %s15_s11 = sshll.u32 %s216_s1, 4  ;;  %s176_s12 = smov [#allocation2]   ;;  %s16_s11 = int_to_ptr.hbm [resolvable:$true] %s15_s11 }
   0x2   :  { %s17_s13 = sshll.u32 %s176_s12, 4  ;;  %s177_s14 = smov 128   ;;  %s18_s13 = int_to_ptr.vmem [resolvable:$true] %s17_s13 }
   0x3   :  { %s178_s15 = smov 8  }
   0x4   :  { %23 = dma.hbm_to_vmem [thread:$0]  %s16_s11, 1024, %s18_s13, [#allocation3], %s177_s14, %s177_s14, %s178_s15  }
   0x5   :  { %172 = dma.done.wait [#allocation3], 1024  }
   0x6   :  { %173 = vsyncadd [#allocation3], 4294966272  ;;  %v179_v0 = vmov 0   ;;  %v28_v1 = vld [vmem:[%s215_s0] sm:$0xff]  ;;  %v51_v2 = vld [vmem:[#allocation2 + $0x38] sm:$0xff]  ;;  %v30_v11 = vlaneseq  ;;  %vm52_vm0 = vcmask 523264  }
   0x7   :  { %123 = vset.pattern.permute.xlu0 %v179_v0  ;;  %67 = vmatpush.msra.mxu0 %v51_v2  ;;  %v50_v3 = vld [vmem:[#allocation2 + $0x30] sm:$0xff]  ;;  %v49_v4 = vld [vmem:[#allocation2 + $0x28] sm:$0xff]  ;;  %v48_v5 = vld [vmem:[#allocation2 + $0x20] sm:$0xff]  ;;  %v180_v14 = vmov 0.0   ;;  %s92_s22 = sshll.u32 %s217_s2, 4  ;;  %s93_s22 = int_to_ptr.hbm [resolvable:$true] %s92_s22 }
   0x8   :  { %33 = vperm.xlu0 %123, %v28_v1   ;;  %109 = vmatpush.msra.mxu1 %v51_v2  ;;  %v29_v6 = vld [vmem:[%s215_s0 + $0x8] sm:$0xff]  ;;  %v47_v7 = vld [vmem:[#allocation2 + $0x18] sm:$0xff]  ;;  %v46_v8 = vld [vmem:[#allocation2 + $0x10] sm:$0xff]  ;;  %v31_v12 = vand.u32 127, %v30_v11  ;;  %s181_s0 = smov [#allocation5]  }
   0x9   :  { %68 = vmatpush.msra.mxu0 %v50_v3  ;;  %v45_v9 = vld [vmem:[#allocation2 + $0x8] sm:$0xff]  ;;  %v44_v10 = vld [vmem:[#allocation2] sm:$0xff]  ;;  %s90_s19 = sshll.u32 %s181_s0, 4  ;;  %s91_s19 = int_to_ptr.vmem [resolvable:$true] %s90_s19 }
   0xa   :  { %110 = vmatpush.msra.mxu1 %v50_v3 }
   0xb   :  { %69 = vmatpush.msra.mxu0 %v49_v4 }
   0xc   :  { %111 = vmatpush.msra.mxu1 %v49_v4 }
   0xd   :  { %70 = vmatpush.msra.mxu0 %v48_v5 }
   0xe   :  { %112 = vmatpush.msra.mxu1 %v48_v5 }
   0xf   :  { %71 = vmatpush.msra.mxu0 %v47_v7 }
  0x10   :  { %36 = vperm.xlu0 %123, %v29_v6   ;;  %113 = vmatpush.msra.mxu1 %v47_v7 }
  0x11   :  { %72 = vmatpush.msra.mxu0 %v46_v8 }
  0x12   :  { %114 = vmatpush.msra.mxu1 %v46_v8 }
  0x13   :  { %73 = vmatpush.msra.mxu0 %v45_v9 }
  0x14   :  { %115 = vmatpush.msra.mxu1 %v45_v9 }
  0x15   :  { %74 = vmatpush.msra.mxu0 %v44_v10 }
  0x16   :  { %116 = vmatpush.msra.mxu1 %v44_v10 }
  0x7a   :  { %v34_v13 = vpop.permute.xlu0 %33 }
  0x7b   :  { %vm38_vm1 = vcmp.eq.s32.totalorder %v34_v13, %v31_v12 }
  0x7c   :  { %v105_v15 = vsel %vm38_vm1, 1.0, %v180_v14 }
  0x7d   :  { %107 = vmatmul.msk.f32.vlgmr.msra.gmra.mxu0 %vm52_vm0, %v105_v15 }
  0x82   :  { %v37_v16 = vpop.permute.xlu0 %36 }
  0x83   :  { %vm39_vm2 = vcmp.eq.s32.totalorder %v37_v16, %v31_v12 }
  0x84   :  { %v106_v17 = vsel %vm39_vm2, 1.0, %v180_v14 }
  0x85   :  { %108 = vmatmul.msk.f32.vlgmr.msra.gmra.mxu1 %vm52_vm0, %v106_v17 }
  0xfa   :  { %v76_v18 = vpop.f32.mrf.mxu0 }
  0xfb   :  { %v82_v19 = vmul.f32 11.313708, %v76_v18 }
  0xfd   :  { %84 = vst [vmem:[#allocation5] sm:$0xff] %v82_v19 }
 0x102   :  { %v79_v20 = vpop.f32.mrf.mxu1 }
 0x103   :  { %v83_v21 = vmul.f32 11.313708, %v79_v20 }
 0x105   :  { %85 = vst [vmem:[#allocation5 + $0x8] sm:$0xff] %v83_v21 }
 0x106   :  { %98 = dma.vmem_to_hbm [thread:$0]  %s91_s19, 256, %s93_s22, [#allocation4], %s177_s14, %s177_s14, %s178_s15  }
 0x107   :  { %174 = dma.done.wait [#allocation4], 256  }
 0x108   :  { %175 = vsyncadd [#allocation4], 4294967040 }
 0x109   :  { %103 = vsyncpa [#allocation3], 1 }
 0x10a   :  { %104 = vsyncpa [#allocation4], 1 }

</bundles_post_ra>
